<compile_context>
chip_gen: v5e
topology: v5e:2x2
jax: 0.10.0
libtpu: 0.0.40
codegen_flags: <defaults>
</compile_context>

<pallas_src>
import functools

import jax
import jax.numpy as jnp
from jax import lax
from jax.experimental import pallas as pl
from jax.experimental.pallas import tpu as pltpu


def _round_up(n: int, m: int) -> int:
    return ((n + m - 1) // m) * m


@functools.lru_cache(maxsize=1)
def _vmem_capacity_bytes() -> int:
    """Physical per-core VMEM (128 MiB v5e/v6e, 64 MiB v7x); conservative fallback."""
    default = 64 * 1024 * 1024
    try:
        info = pltpu.get_tpu_info()
        cap = getattr(info, "vmem_capacity_bytes", None)
        return int(cap) if cap else default
    except Exception:
        return default


def _logreg_kernel(x_ref, w_ref, b_ref, o_ref, acc_ref, *, v_total, tv, w_resident):
    # x_ref  : (TB, TV) input tile, streamed in its incoming dtype (f32 or bf16)
    # w_ref  : (1, TV) weight chunk, or (1, Vp) full VMEM-resident weight row
    # b_ref  : (1, 1)  bias scalar in SMEM
    # o_ref  : (TB, 1) output tile (written once, on the last reduction step)
    # acc_ref: (TB, 1) f32 VMEM accumulator carried across the vocab (k) axis
    k = pl.program_id(1)
    nk = pl.num_programs(1)

    @pl.when(k == 0)
    def _init():
        acc_ref[...] = jnp.zeros_like(acc_ref)

    if w_resident:
        # Whole (zero-padded) weight row lives in VMEM for the entire grid;
        # slice the k-th 128-aligned chunk in-kernel (no per-step weight DMA).
        w = w_ref[:, pl.ds(pl.multiple_of(k * tv, 128), tv)]
    else:
        w = w_ref[...]

    dn = (((1,), (1,)), ((), ()))  # contract x dim 1 with w dim 1 -> (TB, 1)

    def _accumulate(x):
        # MXU contraction (vector-extended slot), bf16/f32 native, f32 accumulate.
        # Keeps the VPU idle so the kernel stays DMA-bound even at v7x HBM rates.
        acc_ref[...] += lax.dot_general(x, w, dn, preferred_element_type=jnp.float32)

    if v_total % tv != 0:
        # Vocab not tile-aligned: the last reduction step reads out-of-bounds
        # lanes (unspecified values) -> mask them to zero before the matmul.
        @pl.when(k < nk - 1)
        def _full_step():
            _accumulate(x_ref[...])

        @pl.when(k == nk - 1)
        def _ragged_step():
            x = x_ref[...]
            col = k * tv + lax.broadcasted_iota(jnp.int32, x.shape, 1)
            _accumulate(jnp.where(col < v_total, x, jnp.zeros_like(x)))
    else:
        _accumulate(x_ref[...])

    @pl.when(k == nk - 1)
    def _finalize():
        z = acc_ref[...] + b_ref[0, 0]
        o_ref[...] = jax.nn.sigmoid(z).astype(o_ref.dtype)  # exp runs on the EUP slot


def _select_tiles(B, V, itemsize, tile_batch, tile_v, x_buf_budget):
    v_lanes = _round_up(V, 128)

    tb = 512 if tile_batch is None else tile_batch
    tb = min(_round_up(max(tb, 16), 16), _round_up(B, 16))

    # Vocab tile: as large as the single-buffer budget allows (x is double-buffered).
    tv_cap = max(128, (x_buf_budget // (tb * itemsize)) // 128 * 128)
    tv = tv_cap if tile_v is None else _round_up(max(tile_v, 128), 128)
    tv = max(128, min(tv, tv_cap, v_lanes))

    if tile_batch is None and tv >= v_lanes:
        # Whole vocab fits in one tile: spend leftover budget on taller batch
        # tiles so each grid step still streams multiple MiB of x.
        tb_cap = max(16, (x_buf_budget // (tv * itemsize)) // 16 * 16)
        tb = min(max(tb, tb_cap), _round_up(B, 16), 4096)

    # Guarantee >= 2 batch tiles so both of v7x's TensorCores get work
    # (the batch axis is the only "parallel" grid dimension).
    if B > 16 and pl.cdiv(B, tb) < 2:
        tb = max(16, min(tb, _round_up(pl.cdiv(B, 2), 16)))
    return tb, tv


@functools.partial(jax.jit, static_argnames=("tile_batch", "tile_v"))
def logistic_regression_forward(x, weight, bias, *, tile_batch=None, tile_v=None):
    """sigmoid(x @ W^T + b).  x: (B, V); weight: (1, V); bias: (1,) -> (B, 1) f32.

    x's dtype is the streaming dtype: passing bf16 x halves HBM traffic (the only
    ~2x lever on this bandwidth-bound GEMV, biggest win on v5e).  The weight is
    then intentionally also streamed in bf16 (documented downcast); the MXU
    contraction still accumulates in f32.
    """
    B, V = x.shape
    stream_dtype = x.dtype
    itemsize = jnp.dtype(stream_dtype).itemsize

    # Generation-aware VMEM budgeting (v5e/v6e: 128 MiB/core, v7x: 64 MiB/core).
    phys = _vmem_capacity_bytes()
    x_buf_budget = phys // 4  # per single x buffer; x is double-buffered

    tb, tv = _select_tiles(B, V, itemsize, tile_batch, tile_v, x_buf_budget)
    grid_b = pl.cdiv(B, tb)
    grid_v = pl.cdiv(V, tv)
    Vp = grid_v * tv

    # x is consumed as-is (no jnp.pad copy of the big operand).  Only the tiny
    # (1, V) weight row is zero-padded so every weight chunk is well-defined.
    w2d = weight.reshape(1, V).astype(stream_dtype)
    if Vp != V:
        w2d = jnp.pad(w2d, ((0, 0), (0, Vp - V)))
    b2d = bias.reshape(1, 1).astype(jnp.float32)

    # Keep the weight VMEM-resident for the whole grid when small enough
    # (removes one DMA issue/wait per grid step); otherwise stream (1, tv) chunks.
    w_resident = Vp * itemsize <= 4 * 1024 * 1024
    if w_resident:
        w_spec = pl.BlockSpec((1, Vp), lambda i, k: (0, 0))
        w_bytes = Vp * itemsize
    else:
        w_spec = pl.BlockSpec((1, tv), lambda i, k: (0, k))
        w_bytes = tv * itemsize

    vmem_need = (2 * tb * tv * itemsize      # double-buffered x tiles
                 + 2 * w_bytes               # weight (resident or chunked)
                 + 2 * tb * 4 + tb * 4       # output blocks + f32 accumulator
                 + (2 << 20))                # slack for compiler scratch
    vmem_limit = int(min(max(vmem_need, 16 << 20), phys - (8 << 20)))

    kernel = functools.partial(
        _logreg_kernel, v_total=V, tv=tv, w_resident=w_resident)

    out = pl.pallas_call(
        kernel,
        out_shape=jax.ShapeDtypeStruct((B, 1), jnp.float32),
        grid_spec=pltpu.PrefetchScalarGridSpec(
            num_scalar_prefetch=0,
            grid=(grid_b, grid_v),   # (batch [parallel], vocab/reduction [arbitrary, last])
            in_specs=[
                pl.BlockSpec((tb, tv), lambda i, k: (i, k)),           # x tile
                w_spec,                                                # weight
                pl.BlockSpec((1, 1), lambda i, k: (0, 0),
                             memory_space=pltpu.SMEM),                 # bias scalar
            ],
            out_specs=pl.BlockSpec((tb, 1), lambda i, k: (i, 0)),
            scratch_shapes=[pltpu.VMEM((tb, 1), jnp.float32)],         # f32 accumulator
        ),
        compiler_params=pltpu.CompilerParams(
            dimension_semantics=("parallel", "arbitrary"),
            vmem_limit_bytes=vmem_limit,
        ),
    )(x, w2d, b2d)
    return out


if __name__ == "__main__":
    # Small, deterministic setup consistent with the module:
    # vocab_size = 256 (feature dim of nn.Linear), batch of 16 messages.
    vocab_size = 256
    batch = 16

    key = jax.random.PRNGKey(0)
    kx, kw, kb = jax.random.split(key, 3)

    # Deterministic parameter init mimicking nn.Linear's default uniform init.
    bound = 1.0 / (vocab_size ** 0.5)
    weight = jax.random.uniform(kw, (1, vocab_size), jnp.float32, -bound, bound)
    bias = jax.random.uniform(kb, (1,), jnp.float32, -bound, bound)

    # TF-IDF-like non-negative inputs.
    x = jax.random.uniform(kx, (batch, vocab_size), jnp.float32, 0.0, 1.0)
    ref = jax.nn.sigmoid(x @ weight.T + bias)

    # f32 path (vocab fits in one tile).
    out = jax.block_until_ready(logistic_regression_forward(x, weight, bias))
    assert out.shape == (batch, 1)
    assert jnp.allclose(out, ref, atol=1e-4, rtol=1e-4), "f32 mismatch vs reference"

    # Ragged batch (no jnp.pad copy of x; OOB rows dropped by block semantics).
    out_r = jax.block_until_ready(logistic_regression_forward(x[:13], weight, bias))
    assert out_r.shape == (13, 1)
    assert jnp.allclose(out_r, ref[:13], atol=1e-4, rtol=1e-4), "ragged-batch mismatch"

    # Ragged vocab + multi-step reduction (in-kernel lane masking + f32 accumulator).
    v2 = 300
    kw2, kx2 = jax.random.split(kw)
    bound2 = 1.0 / (v2 ** 0.5)
    weight2 = jax.random.uniform(kw2, (1, v2), jnp.float32, -bound2, bound2)
    x2 = jax.random.uniform(kx2, (batch, v2), jnp.float32, 0.0, 1.0)
    ref2 = jax.nn.sigmoid(x2 @ weight2.T + bias)
    out2 = jax.block_until_ready(
        logistic_regression_forward(x2, weight2, bias, tile_v=128))
    assert out2.shape == (batch, 1)
    assert jnp.allclose(out2, ref2, atol=1e-4, rtol=1e-4), "ragged-vocab mismatch"

    # bf16 streaming path (half the HBM bytes; weight intentionally streamed bf16,
    # f32 accumulation in-kernel).
    x_bf, w_bf = x.astype(jnp.bfloat16), weight.astype(jnp.bfloat16)
    ref_bf = jax.nn.sigmoid(
        x_bf.astype(jnp.float32) @ w_bf.astype(jnp.float32).T + bias)
    out_bf = jax.block_until_ready(logistic_regression_forward(x_bf, w_bf, bias))
    assert out_bf.shape == (batch, 1)
    assert jnp.allclose(out_bf, ref_bf, atol=2e-3, rtol=2e-3), "bf16 mismatch"

    print("KERNEL_OK")
</pallas_src>

<mosaic_0001>
module attributes {stable_mosaic.version = 11 : i64} {
  func.func @_logreg_kernel(%arg0: i32, %arg1: i32, %arg2: memref<16x256xf32, #tpu.memory_space<vmem>>, %arg3: memref<1x256xf32, #tpu.memory_space<vmem>>, %arg4: memref<1x1xf32, #tpu.memory_space<smem>>, %arg5: memref<16x1xf32, #tpu.memory_space<vmem>>, %arg6: memref<16x1xf32, #tpu.memory_space<vmem>>) attributes {dimension_semantics = [#tpu.dimension_semantics<parallel>, #tpu.dimension_semantics<arbitrary>], iteration_bounds = array<i64: 1, 1>, scalar_prefetch = 0 : i64, scratch_operands = 1 : i64, tpu.core_type = #tpu.core_type<tc>, window_params = [{transform_indices = @transform_0, window_bounds = array<i64: 16, 256>}, {pipeline_mode = #tpu.pipeline_mode<synchronous>, transform_indices = @transform_1, window_bounds = array<i64: 1, 256>}, {transform_indices = @transform_2, window_bounds = array<i64: 1, 1>}, {transform_indices = @transform_3, window_bounds = array<i64: 16, 1>}]} {
    %c0_i32 = arith.constant 0 : i32
    %0 = arith.cmpi eq, %arg1, %c0_i32 : i32
    %1 = arith.extui %0 : i1 to i32
    %c0_i32_0 = arith.constant 0 : i32
    %2 = arith.cmpi ne, %1, %c0_i32_0 : i32
    scf.if %2 {
      %cst_9 = arith.constant 0.000000e+00 : f32
      %15 = vector.broadcast %cst_9 : f32 to vector<16x1xf32>
      %c0_10 = arith.constant 0 : index
      %c0_11 = arith.constant 0 : index
      %16 = vector.load %arg6[%c0_10, %c0_11] : memref<16x1xf32, #tpu.memory_space<vmem>>, vector<16x1xf32>
      tpu.vector_store %arg6[%c0_10, %c0_11], %15 {strides = array<i32>} : memref<16x1xf32, #tpu.memory_space<vmem>>, vector<16x1xf32>,
    } else {
    }
    %c256_i32 = arith.constant 256 : i32
    %3 = arith.muli %arg1, %c256_i32 : i32
    %4 = tpu.assume_multiple %3, 128 : i32
    %c0 = arith.constant 0 : index
    %5 = arith.index_cast %4 : i32 to index
    %6 = vector.load %arg3[%c0, %5] : memref<1x256xf32, #tpu.memory_space<vmem>>, vector<1x256xf32>
    %c0_1 = arith.constant 0 : index
    %c0_2 = arith.constant 0 : index
    %7 = vector.load %arg2[%c0_1, %c0_2] : memref<16x256xf32, #tpu.memory_space<vmem>>, vector<16x256xf32>
    %c0_3 = arith.constant 0 : index
    %c0_4 = arith.constant 0 : index
    %8 = vector.load %arg6[%c0_3, %c0_4] : memref<16x1xf32, #tpu.memory_space<vmem>>, vector<16x1xf32>
    %cst = arith.constant dense<0.000000e+00> : vector<16x1xf32>
    %9 = tpu.matmul %7, %6, %cst {dimension_numbers = #tpu.dot_dimension_numbers<[1], [1], [0], [0], [0, 0, 1, 0], [], []>} : vector<16x256xf32>, vector<1x256xf32>, vector<16x1xf32> -> vector<16x1xf32>
    %10 = arith.addf %8, %9 : vector<16x1xf32>
    %c0_5 = arith.constant 0 : index
    %c0_6 = arith.constant 0 : index
    %11 = vector.load %arg6[%c0_5, %c0_6] : memref<16x1xf32, #tpu.memory_space<vmem>>, vector<16x1xf32>
    tpu.vector_store %arg6[%c0_5, %c0_6], %10 {strides = array<i32>} : memref<16x1xf32, #tpu.memory_space<vmem>>, vector<16x1xf32>,
    %c0_i32_7 = arith.constant 0 : i32
    %12 = arith.cmpi eq, %arg1, %c0_i32_7 : i32
    %13 = arith.extui %12 : i1 to i32
    %c0_i32_8 = arith.constant 0 : i32
    %14 = arith.cmpi ne, %13, %c0_i32_8 : i32
    scf.if %14 {
      %c0_9 = arith.constant 0 : index
      %c0_10 = arith.constant 0 : index
      %15 = vector.load %arg6[%c0_9, %c0_10] : memref<16x1xf32, #tpu.memory_space<vmem>>, vector<16x1xf32>
      %c0_11 = arith.constant 0 : index
      %c0_12 = arith.constant 0 : index
      %16 = memref.load %arg4[%c0_11, %c0_12] : memref<1x1xf32, #tpu.memory_space<smem>>
      %17 = vector.broadcast %16 : f32 to vector<16x1xf32>
      %18 = arith.addf %15, %17 : vector<16x1xf32>
      %19 = arith.negf %18 : vector<16x1xf32>
      %20 = math.exp %19 : vector<16x1xf32>
      %cst_13 = arith.constant 1.000000e+00 : f32
      %21 = vector.broadcast %cst_13 : f32 to vector<16x1xf32>
      %22 = arith.addf %21, %20 : vector<16x1xf32>
      %23 = arith.divf %21, %22 : vector<16x1xf32>
      %c0_14 = arith.constant 0 : index
      %c0_15 = arith.constant 0 : index
      %24 = vector.load %arg5[%c0_14, %c0_15] : memref<16x1xf32, #tpu.memory_space<vmem>>, vector<16x1xf32>
      tpu.vector_store %arg5[%c0_14, %c0_15], %23 {strides = array<i32>} : memref<16x1xf32, #tpu.memory_space<vmem>>, vector<16x1xf32>,
    } else {
    }
    return
  }
  func.func @transform_0(%arg0: i32, %arg1: i32) -> (i32, i32) {
    %c0_i32 = arith.constant 0 : i32
    return %arg0, %arg1 : i32, i32
  }
  func.func @transform_1(%arg0: i32, %arg1: i32) -> (i32, i32) {
    %c0_i32 = arith.constant 0 : i32
    %c0_i32_0 = arith.constant 0 : i32
    %c0_i32_1 = arith.constant 0 : i32
    return %c0_i32, %c0_i32_0 : i32, i32
  }
  func.func @transform_2(%arg0: i32, %arg1: i32) -> (i32, i32) {
    %c0_i32 = arith.constant 0 : i32
    %c0_i32_0 = arith.constant 0 : i32
    %c0_i32_1 = arith.constant 0 : i32
    return %c0_i32, %c0_i32_0 : i32, i32
  }
  func.func @transform_3(%arg0: i32, %arg1: i32) -> (i32, i32) {
    %c0_i32 = arith.constant 0 : i32
    %c0_i32_0 = arith.constant 0 : i32
    return %arg0, %c0_i32 : i32, i32
  }
}

</mosaic_0001>

<bundles_post_ra>
// kernel: logistic_regression_forward.1
= control target key start
LH: loop header
LB: loop body
LE: loop exit
PB: predicated region body
PF: predicated region fallthrough
CT: control target
= control target key end

     0   :  { %9 = vsyncpa [#allocation5], 0  ;;  %s164_s15 = smov [#allocation4]   ;;  %s165_s17 = smov 256   ;;  %s209_s0 = inlined_call_operand.hbm [shape: f32[16,256], index: 0, kind: input, shape index: {}]   ;;  %s210_s1 = inlined_call_operand.vmem [shape: f32[1,256], index: 1, kind: input, shape index: {}]   ;;  %s211_s2 = inlined_call_operand.<no memory space> [shape: f32[1,1], index: 2, kind: input, shape index: {}]   ;;  %s212_s3 = inlined_call_operand.vmem [shape: f32[16,1], index: 3, kind: output, shape index: {}]  }
   0x1   :  { %s14_s14 = sshll.u32 %s209_s0, 4  ;;  %s16_s16 = sshll.u32 %s164_s15, 4  ;;  %s15_s14 = int_to_ptr.hbm [resolvable:$true] %s14_s14  ;;  %s17_s16 = int_to_ptr.vmem [resolvable:$true] %s16_s16 }
   0x2   :  { %s166_s18 = smov 16  }
   0x3   :  { %22 = dma.hbm_to_vmem [thread:$0]  %s15_s14, 512, %s17_s16, [#allocation5], %s165_s17, %s165_s17, %s166_s18  }
   0x4   :  { %162 = dma.done.wait [#allocation5], 512  }
   0x5   :  { %163 = vsyncadd [#allocation5], 4294966784  ;;  %vm35_vm0 = vcmask 7168   ;;  %v167_v0 = vmov 0.0   ;;  %v42_v1 = vld [vmem:[%s210_s1] sm:$0x3]  ;;  %v75_v18 = vstv %s211_s2 }
   0x6   :  { %36 = vst.msk [vmem:[#allocation2] sm:$0xff] %vm35_vm0, %v167_v0  ;;  %v43_v2 = vld [vmem:[#allocation4] sm:$0xff]  ;;  %v44_v3 = vld [vmem:[#allocation4 + $0x8] sm:$0xff]  ;;  %v50_v4 = vperm.slane %v42_v1, 0  ;;  %v51_v5 = vperm.slane %v42_v1, 1  ;;  %v45_v8 = vld [vmem:[#allocation4 + $0x10] sm:$0xff] }
   0x7   :  { %37 = vst.msk [vmem:[#allocation2 + $0x8] sm:$0xff] %vm35_vm0, %v167_v0  ;;  %v46_v9 = vld [vmem:[#allocation4 + $0x18] sm:$0xff] }
   0x8   :  { %v54_v6 = vmul.f32 %v50_v4, %v43_v2  ;;  %v55_v7 = vmul.f32 %v51_v5, %v44_v3  ;;  %v56_v11 = vmul.f32 %v50_v4, %v45_v8  ;;  %v57_v12 = vmul.f32 %v51_v5, %v46_v9 }
   0xa   :  { %v58_v10 = vadd.f32 %v55_v7, %v54_v6  ;;  %v61_v13 = vadd.f32 %v57_v12, %v56_v11 }
   0xc   :  { %59 = vadd.xlane.f32.xlu0 %v58_v10 }
   0xd   :  { %v47_v14 = vld [vmem:[#allocation2] sm:$0xff] }
   0xe   :  { %v48_v17 = vld [vmem:[#allocation2 + $0x8] sm:$0xff] }
  0x14   :  { %62 = vadd.xlane.f32.xlu0 %v61_v13 }
  0x7f   :  { %v60_v15 = vpop.xlane.xlu0 %59 }
  0x80   :  { %v64_v16 = vadd.f32 %v60_v15, %v47_v14 }
  0x82   :  { %67 = vst.msk [vmem:[#allocation2] sm:$0xff] %vm35_vm0, %v64_v16 }
  0x87   :  { %v63_v19 = vpop.xlane.xlu0 %62 }
  0x88   :  { %v65_v20 = vadd.f32 %v63_v19, %v48_v17 }
  0x89   :  { %v72_v21 = vld [vmem:[#allocation2] sm:$0xff] }
  0x8a   :  { %v76_v22 = vadd.f32 %v75_v18, %v72_v21  ;;  %68 = vst.msk [vmem:[#allocation2 + $0x8] sm:$0xff] %vm35_vm0, %v65_v20 }
  0x8c   :  { %v124_v23 = vmul.f32 -1.442695, %v76_v22 }
  0x8e   :  { %130 = vpow2.f32 %v124_v23 }
  0x91   :  { %v73_v24 = vld [vmem:[#allocation2 + $0x8] sm:$0xff] }
  0x92   :  { %v77_v25 = vadd.f32 %v75_v18, %v73_v24 }
  0x94   :  { %v131_v26 = vpop.eup %130  ;;  %v125_v27 = vmul.f32 -1.442695, %v77_v25 }
  0x95   :  { %v84_v28 = vadd.f32 1.0, %v131_v26 }
  0x96   :  { %132 = vpow2.f32 %v125_v27 }
  0x97   :  { %134 = vrcp.f32 %v84_v28  ;;  %v97_v34 = vand.u32 2147483648, %v84_v28  ;;  %v95_v36 = vand.u32 2147483647, %v84_v28  ;;  %vm91_vm2 = vweird.f32 %v84_v28 }
  0x99   :  { %v98_v39 = vor.u32 1.1754944e-38, %v97_v34  ;;  %vm96_vm4 = vcmp.eq.f32.partialorder %v95_v36, 8.507059e+37 }
  0x9c   :  { %v133_v29 = vpop.eup %132 }
  0x9d   :  { %v135_v30 = vpop.eup %134  ;;  %v85_v31 = vadd.f32 1.0, %v133_v29 }
  0x9e   :  { %v87_v32 = vmul.f32 %v135_v30, %v84_v28  ;;  %vm92_vm1 = vweird.f32 %v135_v30 }
  0x9f   :  { %136 = vrcp.f32 %v85_v31  ;;  %vm93_vm3 = vmor %vm91_vm2, %vm92_vm1  ;;  %v112_v44 = vand.u32 2147483648, %v85_v31  ;;  %v110_v46 = vand.u32 2147483647, %v85_v31  ;;  %vm106_vm6 = vweird.f32 %v85_v31 }
  0xa0   :  { %v88_v33 = vsub.f32 1.0, %v87_v32 }
  0xa1   :  { %v113_v48 = vor.u32 1.1754944e-38, %v112_v44  ;;  %vm111_vm8 = vcmp.eq.f32.partialorder %v110_v46, 8.507059e+37 }
  0xa2   :  { %v89_v35 = vmul.f32 %v135_v30, %v88_v33 }
  0xa4   :  { %v90_v37 = vadd.f32 %v135_v30, %v89_v35 }
  0xa5   :  { %v137_v38 = vpop.eup %136 }
  0xa6   :  { %v94_v40 = vsel %vm93_vm3, %v135_v30, %v90_v37  ;;  %v102_v41 = vmul.f32 %v137_v38, %v85_v31  ;;  %vm107_vm5 = vweird.f32 %v137_v38 }
  0xa7   :  { %v99_v42 = vsel %vm96_vm4, %v98_v39, %v94_v40  ;;  %vm108_vm7 = vmor %vm106_vm6, %vm107_vm5 }
  0xa8   :  { %116 = vst.msk [vmem:[%s212_s3] sm:$0xff] %vm35_vm0, %v99_v42  ;;  %v103_v43 = vsub.f32 1.0, %v102_v41 }
  0xaa   :  { %v104_v45 = vmul.f32 %v137_v38, %v103_v43 }
  0xac   :  { %v105_v47 = vadd.f32 %v137_v38, %v104_v45 }
  0xae   :  { %v109_v49 = vsel %vm108_vm7, %v137_v38, %v105_v47 }
  0xaf   :  { %v114_v50 = vsel %vm111_vm8, %v113_v48, %v109_v49 }
  0xb0   :  { %117 = vst.msk [vmem:[%s212_s3 + $0x8] sm:$0xff] %vm35_vm0, %v114_v50 }
  0xb1   :  { %122 = vsyncpa [#allocation5], 1 }

</bundles_post_ra>
